<compile_context>
chip_gen: v7x
topology: tpu7x:2x2x1
jax: 0.10.0
libtpu: 0.0.40
codegen_flags: <defaults>
</compile_context>

<pallas_src>
import math
import functools

import jax
import jax.numpy as jnp
import numpy as np
from jax.experimental import pallas as pl
from jax.experimental.pallas import tpu as pltpu

EMB = 32
HEADS = 4
D_HEAD = EMB // HEADS
FWD_EXP = 4
HIDDEN = FWD_EXP * EMB
SEQ = 8
BATCH = 2
EPS = 1e-5
NEG_INF = -1e15

# Sublane layout of the 128-lane matmul-weight pack.
ROW_W1 = 0
ROW_W2 = EMB
ROW_WO = EMB + HIDDEN
WMM_ROWS = ROW_WO + EMB

# Rows 0..7 of the const pack: b1, bqkv, bo, g1, be1, b2, g2, be2; then the
# per-(batch, head, q) rows [head mask | additive mask bias | batch keep].
CONST_ROWS = 8


def _layer_norm(x, gamma, beta):
    mu = jnp.mean(x, axis=-1, keepdims=True)
    var = jnp.mean((x - mu) ** 2, axis=-1, keepdims=True)
    return (x - mu) * jax.lax.rsqrt(var + EPS) * gamma + beta


def transformer_block_kernel(x_ref, wqkv_ref, wmm_ref, cpk_ref, out_ref, *, batch, seq):
    f32 = jnp.float32
    rows = batch * seq                 # flattened (batch, seq)
    hs_rows = batch * HEADS * seq      # flattened (batch, head, seq)

    x = x_ref[...]                     # (rows, 3E) lane-concat [q | k | v], f32
    xq = x[:, :EMB]                    # residual (original query)

    # ---------------- packed constants (static slices) ----------------
    b1 = cpk_ref[0:1, :HIDDEN]
    bqkv = cpk_ref[1:2, :3 * EMB]
    bo = cpk_ref[2:3, :EMB]
    g1 = cpk_ref[3:4, :EMB]
    be1 = cpk_ref[4:5, :EMB]
    b2 = cpk_ref[5:6, :EMB]
    g2 = cpk_ref[6:7, :EMB]
    be2 = cpk_ref[7:8, :EMB]
    attc = cpk_ref[CONST_ROWS:CONST_ROWS + hs_rows, :]
    hmask = attc[:, :EMB]                              # (BHS, E) head-column 0/1 mask
    mask_bias = attc[:, EMB:EMB + rows]                # (BHS, B*S) additive 0 / -1e15
    keep = attc[:, EMB + rows:EMB + 2 * rows]          # (BHS, B*S) same-batch 0/1 mask

    # --------- fused q/k/v projections: ONE block-diagonal MXU push ---------
    qkv = jnp.dot(x, wqkv_ref[...], preferred_element_type=f32) + bqkv     # (rows, 3E)
    qh = qkv[:, :EMB]                  # already pre-scaled by 1/sqrt(EMB)
    kh = qkv[:, EMB:2 * EMB]
    vh = qkv[:, 2 * EMB:3 * EMB]

    # --------- per-head energies for ALL batches: ONE dot_general ---------
    # Row (b, h, q) of qs keeps only head-h columns of qh[b, q]; dotting with
    # kh^T yields e[(b,h,q), (b',k)]; cross-batch columns are dropped via `keep`.
    qs = jnp.broadcast_to(qh.reshape(batch, 1, seq, EMB),
                          (batch, HEADS, seq, EMB)).reshape(hs_rows, EMB) * hmask
    e = jax.lax.dot_general(qs, kh, (((1,), (1,)), ((), ())),
                            preferred_element_type=f32)                    # (BHS, B*S)
    s = e + mask_bias

    # Softmax over the HEAD axis (PyTorch softmax(dim=1) quirk), numerically stable.
    s4 = s.reshape(batch, HEADS, seq, rows)
    ex = jnp.exp(s4 - jnp.max(s4, axis=1, keepdims=True))
    den = jnp.sum(ex, axis=1, keepdims=True)
    att = (ex / den).reshape(hs_rows, rows)

    # einsum('nhqk,nlhd->nqhd') separates: out = (sum_k att) * (sum_l v).
    rowsum = jnp.sum(att * keep, axis=1, keepdims=True)                    # (BHS, 1)
    vsum = jnp.sum(vh.reshape(batch, seq, EMB), axis=1, keepdims=True)     # (B, 1, E)
    asum = jnp.sum((rowsum * hmask).reshape(batch, HEADS, seq, EMB), axis=1)  # (B, S, E)
    att_cat = (asum * vsum).reshape(rows, EMB)

    # ---------------- w_o projection, residual, LayerNorm 1 ----------------
    wo = wmm_ref[ROW_WO:ROW_WO + EMB, :]                                   # (E, 128) zero-padded
    att_out = jnp.dot(att_cat, wo, preferred_element_type=f32)[:, :EMB] + bo
    skip1 = _layer_norm(att_out + xq, g1, be1)        # dropout = identity (eval mode)

    # ---------------- FFN: Linear -> ReLU -> Linear, LayerNorm 2 ----------------
    w1 = wmm_ref[ROW_W1:ROW_W1 + EMB, :]                                   # (E, HIDDEN)
    w2 = wmm_ref[ROW_W2:ROW_W2 + HIDDEN, :]                                # (HIDDEN, 128) zero-padded
    h1 = jnp.maximum(jnp.dot(skip1, w1, preferred_element_type=f32) + b1, 0.0)
    ffn = jnp.dot(h1, w2, preferred_element_type=f32)[:, :EMB] + b2
    out_ref[...] = _layer_norm(ffn + skip1, g2, be2)  # dropout = identity (eval mode)


def _pack_weights(params):
    """Mask-independent weight packs (f32)."""
    f32 = jnp.float32
    scale = jnp.float32(1.0 / math.sqrt(EMB))
    eye_h = jnp.eye(HEADS, dtype=f32)
    # Per-head Linear weights are shared across heads -> block-diagonal (E, E).
    wq_d = jnp.kron(eye_h, params["wq_t"].astype(f32)) * scale   # q pre-scaled by 1/sqrt(E)
    wk_d = jnp.kron(eye_h, params["wk_t"].astype(f32))
    wv_d = jnp.kron(eye_h, params["wv_t"].astype(f32))
    z = jnp.zeros((EMB, EMB), f32)
    wqkv = jnp.concatenate([
        jnp.concatenate([wq_d, z, z], axis=1),
        jnp.concatenate([z, wk_d, z], axis=1),
        jnp.concatenate([z, z, wv_d], axis=1)], axis=0)          # (3E, 3E)

    def pad128(w):
        w = jnp.asarray(w, f32)
        return jnp.pad(w, ((0, 0), (0, HIDDEN - w.shape[1])))

    wmm = jnp.concatenate([pad128(params["w1_t"]),               # rows ROW_W1..
                           pad128(params["w2_t"]),               # rows ROW_W2..
                           pad128(params["wo_t"])], axis=0)      # rows ROW_WO..
    return wqkv, wmm


def _pack_consts(params, mask, batch, s_q, s_k):
    """128-lane const pack: biases / LN params / head mask / mask bias / batch keep."""
    f32 = jnp.float32
    scale = jnp.float32(1.0 / math.sqrt(EMB))
    rows = batch * s_k
    hs_rows = batch * HEADS * s_q
    lanes = max(HIDDEN, 3 * EMB, EMB + 2 * rows)

    def row(x):
        r = jnp.asarray(x, f32).reshape(1, -1)
        return jnp.pad(r, ((0, 0), (0, lanes - r.shape[1])))

    bqkv = jnp.concatenate(
        [jnp.tile(jnp.asarray(params["bq"], f32).reshape(1, -1), (1, HEADS)) * scale,
         jnp.tile(jnp.asarray(params["bk"], f32).reshape(1, -1), (1, HEADS)),
         jnp.tile(jnp.asarray(params["bv"], f32).reshape(1, -1), (1, HEADS))], axis=1)

    head_of_row = jnp.arange(HEADS * s_q, dtype=jnp.int32) // s_q
    col_head = jnp.arange(EMB, dtype=jnp.int32) // D_HEAD
    hmask = (head_of_row[:, None] == col_head[None, :]).astype(f32)      # (HS, E)
    hmask_full = jnp.tile(hmask, (batch, 1))                              # (BHS, E)

    # Additive mask bias, precomputed in the wrapper (no in-kernel compare/select).
    mask_b = jnp.broadcast_to(mask, (batch, HEADS, s_q, s_k))
    bias4 = jnp.where(mask_b == 0, jnp.float32(NEG_INF), jnp.float32(0.0))
    eye_b = jnp.eye(batch, dtype=f32)
    mask_bias = (eye_b[:, None, :, None] *
                 bias4.reshape(batch, HEADS * s_q, 1, s_k)).reshape(hs_rows, rows)
    keep = jnp.kron(eye_b, jnp.ones((HEADS * s_q, s_k), f32))             # (BHS, B*Sk)

    attc = jnp.concatenate([hmask_full, mask_bias, keep], axis=1)
    attc = jnp.pad(attc, ((0, 0), (0, lanes - attc.shape[1])))

    return jnp.concatenate(
        [row(params["b1"]), row(bqkv), row(params["bo"]), row(params["g1"]),
         row(params["be1"]), row(params["b2"]), row(params["g2"]), row(params["be2"]),
         attc], axis=0)                                                   # (8 + BHS, lanes)


@jax.jit
def transformer_block(query, key, value, mask, params):
    batch, s_q, emb = query.shape
    s_k = key.shape[1]
    assert emb == EMB
    # TODO(synk): the lane-packed [q|k|v] input assumes query/key/value share a
    # sequence length (self-attention); unequal lengths would need separate refs.
    assert key.shape == (batch, s_q, EMB) and value.shape == (batch, s_q, EMB)
    rows = batch * s_q

    x_in = jnp.concatenate([query, key, value], axis=-1).astype(jnp.float32)
    x_in = x_in.reshape(rows, 3 * EMB)
    wqkv, wmm = _pack_weights(params)
    cpk = _pack_consts(params, mask, batch, s_q, s_k)

    kernel = functools.partial(transformer_block_kernel, batch=batch, seq=s_q)

    # Single grid step: the kernel is fixed-latency bound at this size, so
    # splitting across TensorCores would only duplicate the weight/const DMAs.
    grid_spec = pltpu.PrefetchScalarGridSpec(
        num_scalar_prefetch=0,
        grid=(1,),
        in_specs=[
            pl.BlockSpec(x_in.shape, lambda i: (0, 0)),
            pl.BlockSpec(wqkv.shape, lambda i: (0, 0)),
            pl.BlockSpec(wmm.shape, lambda i: (0, 0)),
            pl.BlockSpec(cpk.shape, lambda i: (0, 0)),
        ],
        out_specs=pl.BlockSpec((rows, EMB), lambda i: (0, 0)),
    )
    out = pl.pallas_call(
        kernel,
        out_shape=jax.ShapeDtypeStruct((rows, EMB), jnp.float32),
        grid_spec=grid_spec,
        compiler_params=pltpu.CompilerParams(dimension_semantics=("arbitrary",)),
    )(x_in, wqkv, wmm, cpk)
    return out.reshape(batch, s_q, EMB)


def init_params(key):
    ks = jax.random.split(key, 12)
    w = lambda k, shape, s=0.2: jax.random.normal(k, shape, jnp.float32) * s
    return {
        "wq_t": w(ks[0], (D_HEAD, D_HEAD)), "bq": w(ks[1], (1, D_HEAD)),
        "wk_t": w(ks[2], (D_HEAD, D_HEAD)), "bk": w(ks[3], (1, D_HEAD)),
        "wv_t": w(ks[4], (D_HEAD, D_HEAD)), "bv": w(ks[5], (1, D_HEAD)),
        "wo_t": w(ks[6], (EMB, EMB)),       "bo": w(ks[7], (1, EMB)),
        "g1": jnp.ones((1, EMB), jnp.float32), "be1": jnp.zeros((1, EMB), jnp.float32),
        "w1_t": w(ks[8], (EMB, HIDDEN)),    "b1": w(ks[9], (1, HIDDEN)),
        "w2_t": w(ks[10], (HIDDEN, EMB)),   "b2": w(ks[11], (1, EMB)),
        "g2": jnp.ones((1, EMB), jnp.float32), "be2": jnp.zeros((1, EMB), jnp.float32),
    }


def reference(query, key, value, mask, p):
    # Pure-JAX (f32, highest precision) transcription of the PyTorch forward (eval mode).
    hp = jax.lax.Precision.HIGHEST
    b, ql, _ = query.shape
    q_r = query.reshape(b, ql, HEADS, D_HEAD)
    k_r = key.reshape(b, key.shape[1], HEADS, D_HEAD)
    v_r = value.reshape(b, value.shape[1], HEADS, D_HEAD)
    q_p = jnp.einsum("bqhd,de->bqhe", q_r, p["wq_t"], precision=hp) + p["bq"][0]
    k_p = jnp.einsum("bkhd,de->bkhe", k_r, p["wk_t"], precision=hp) + p["bk"][0]
    v_p = jnp.einsum("blhd,de->blhe", v_r, p["wv_t"], precision=hp) + p["bv"][0]
    energy = jnp.einsum("nqhd,nkhd->nhqk", q_p, k_p, precision=hp)
    energy = jnp.where(mask == 0, -1e15, energy)
    att = jax.nn.softmax(energy / math.sqrt(EMB), axis=1)
    out = jnp.einsum("nhqk,nlhd->nqhd", att, v_p, precision=hp).reshape(b, ql, EMB)
    att_out = jnp.einsum("nqe,ef->nqf", out, p["wo_t"], precision=hp) + p["bo"][0]

    def ln(x, g, bb):
        mu = x.mean(-1, keepdims=True)
        var = ((x - mu) ** 2).mean(-1, keepdims=True)
        return (x - mu) / jnp.sqrt(var + EPS) * g[0] + bb[0]

    skip1 = ln(att_out + query, p["g1"], p["be1"])
    h1 = jnp.maximum(
        jnp.einsum("nqe,eh->nqh", skip1, p["w1_t"], precision=hp) + p["b1"][0], 0.0)
    ffn = jnp.einsum("nqh,he->nqe", h1, p["w2_t"], precision=hp) + p["b2"][0]
    return ln(ffn + skip1, p["g2"], p["be2"])


if __name__ == "__main__":
    root = jax.random.PRNGKey(0)
    k_in, k_par = jax.random.split(root)
    kq, kk, kv = jax.random.split(k_in, 3)

    query = jax.random.normal(kq, (BATCH, SEQ, EMB), jnp.float32)
    key_t = jax.random.normal(kk, (BATCH, SEQ, EMB), jnp.float32)
    value = jax.random.normal(kv, (BATCH, SEQ, EMB), jnp.float32)
    causal = (jnp.arange(SEQ)[:, None] >= jnp.arange(SEQ)[None, :]).astype(jnp.float32)
    mask = jnp.tile(causal[None, None], (BATCH, HEADS, 1, 1))

    params = init_params(k_par)

    out = transformer_block(query, key_t, value, mask, params)
    out = jax.block_until_ready(out)

    assert out.shape == (BATCH, SEQ, EMB)
    assert bool(jnp.all(jnp.isfinite(out)))

    ref = reference(query, key_t, value, mask, params)
    np.testing.assert_allclose(np.asarray(out), np.asarray(ref), rtol=2e-3, atol=2e-3)

    print("KERNEL_OK")
</pallas_src>

<mosaic_0001>
module attributes {stable_mosaic.version = 11 : i64} {
  func.func @transformer_block_kernel(%arg0: i32, %arg1: memref<16x96xf32, #tpu.memory_space<vmem>>, %arg2: memref<96x96xf32, #tpu.memory_space<vmem>>, %arg3: memref<192x128xf32, #tpu.memory_space<vmem>>, %arg4: memref<72x128xf32, #tpu.memory_space<vmem>>, %arg5: memref<16x32xf32, #tpu.memory_space<vmem>>) attributes {dimension_semantics = [#tpu.dimension_semantics<arbitrary>], iteration_bounds = array<i64: 1>, scalar_prefetch = 0 : i64, scratch_operands = 0 : i64, tpu.core_type = #tpu.core_type<tc>, window_params = [{pipeline_mode = #tpu.pipeline_mode<synchronous>, transform_indices = @transform_0, window_bounds = array<i64: 16, 96>}, {pipeline_mode = #tpu.pipeline_mode<synchronous>, transform_indices = @transform_1, window_bounds = array<i64: 96, 96>}, {pipeline_mode = #tpu.pipeline_mode<synchronous>, transform_indices = @transform_2, window_bounds = array<i64: 192, 128>}, {pipeline_mode = #tpu.pipeline_mode<synchronous>, transform_indices = @transform_3, window_bounds = array<i64: 72, 128>}, {pipeline_mode = #tpu.pipeline_mode<synchronous>, transform_indices = @transform_4, window_bounds = array<i64: 16, 32>}]} {
    %c0 = arith.constant 0 : index
    %c0_0 = arith.constant 0 : index
    %0 = vector.load %arg1[%c0, %c0_0] : memref<16x96xf32, #tpu.memory_space<vmem>>, vector<16x96xf32>
    %1 = vector.extract_strided_slice %0 {offsets = [0, 0], sizes = [16, 32], strides = [1, 1]} : vector<16x96xf32> to vector<16x32xf32>
    %c0_1 = arith.constant 0 : index
    %c0_2 = arith.constant 0 : index
    %2 = vector.load %arg4[%c0_1, %c0_2] : memref<72x128xf32, #tpu.memory_space<vmem>>, vector<1x128xf32>
    %c1 = arith.constant 1 : index
    %c0_3 = arith.constant 0 : index
    %3 = vector.load %arg4[%c1, %c0_3] : memref<72x128xf32, #tpu.memory_space<vmem>>, vector<1x96xf32>
    %c2 = arith.constant 2 : index
    %c0_4 = arith.constant 0 : index
    %4 = vector.load %arg4[%c2, %c0_4] : memref<72x128xf32, #tpu.memory_space<vmem>>, vector<1x32xf32>
    %c3 = arith.constant 3 : index
    %c0_5 = arith.constant 0 : index
    %5 = vector.load %arg4[%c3, %c0_5] : memref<72x128xf32, #tpu.memory_space<vmem>>, vector<1x32xf32>
    %c4 = arith.constant 4 : index
    %c0_6 = arith.constant 0 : index
    %6 = vector.load %arg4[%c4, %c0_6] : memref<72x128xf32, #tpu.memory_space<vmem>>, vector<1x32xf32>
    %c5 = arith.constant 5 : index
    %c0_7 = arith.constant 0 : index
    %7 = vector.load %arg4[%c5, %c0_7] : memref<72x128xf32, #tpu.memory_space<vmem>>, vector<1x32xf32>
    %c6 = arith.constant 6 : index
    %c0_8 = arith.constant 0 : index
    %8 = vector.load %arg4[%c6, %c0_8] : memref<72x128xf32, #tpu.memory_space<vmem>>, vector<1x32xf32>
    %c7 = arith.constant 7 : index
    %c0_9 = arith.constant 0 : index
    %9 = vector.load %arg4[%c7, %c0_9] : memref<72x128xf32, #tpu.memory_space<vmem>>, vector<1x32xf32>
    %c8 = arith.constant 8 : index
    %c0_10 = arith.constant 0 : index
    %10 = vector.load %arg4[%c8, %c0_10] : memref<72x128xf32, #tpu.memory_space<vmem>>, vector<64x128xf32>
    %11 = vector.extract_strided_slice %10 {offsets = [0, 0], sizes = [64, 32], strides = [1, 1]} : vector<64x128xf32> to vector<64x32xf32>
    %12 = vector.extract_strided_slice %10 {offsets = [0, 32], sizes = [64, 16], strides = [1, 1]} : vector<64x128xf32> to vector<64x16xf32>
    %13 = vector.extract_strided_slice %10 {offsets = [0, 48], sizes = [64, 16], strides = [1, 1]} : vector<64x128xf32> to vector<64x16xf32>
    %c0_11 = arith.constant 0 : index
    %c0_12 = arith.constant 0 : index
    %14 = vector.load %arg2[%c0_11, %c0_12] : memref<96x96xf32, #tpu.memory_space<vmem>>, vector<96x96xf32>
    %cst = arith.constant dense<0.000000e+00> : vector<16x96xf32>
    %15 = tpu.matmul %0, %14, %cst {dimension_numbers = #tpu.dot_dimension_numbers<[1], [0], [0], [1], [0, 0, 1, 1], [], []>} : vector<16x96xf32>, vector<96x96xf32>, vector<16x96xf32> -> vector<16x96xf32>
    %16 = vector.broadcast %3 : vector<1x96xf32> to vector<16x96xf32>
    %17 = arith.addf %15, %16 : vector<16x96xf32>
    %18 = vector.extract_strided_slice %17 {offsets = [0, 0], sizes = [16, 32], strides = [1, 1]} : vector<16x96xf32> to vector<16x32xf32>
    %19 = vector.extract_strided_slice %17 {offsets = [0, 32], sizes = [16, 32], strides = [1, 1]} : vector<16x96xf32> to vector<16x32xf32>
    %20 = vector.extract_strided_slice %17 {offsets = [0, 64], sizes = [16, 32], strides = [1, 1]} : vector<16x96xf32> to vector<16x32xf32>
    %21 = vector.shape_cast %18 : vector<16x32xf32> to vector<2x1x8x32xf32>
    %22 = vector.shape_cast %21 : vector<2x1x8x32xf32> to vector<2x1x8x32xf32>
    %23 = vector.broadcast %22 : vector<2x1x8x32xf32> to vector<2x4x8x32xf32>
    %24 = vector.shape_cast %23 : vector<2x4x8x32xf32> to vector<64x32xf32>
    %25 = arith.mulf %24, %11 : vector<64x32xf32>
    %cst_13 = arith.constant dense<0.000000e+00> : vector<64x16xf32>
    %26 = tpu.matmul %25, %19, %cst_13 {dimension_numbers = #tpu.dot_dimension_numbers<[1], [1], [0], [0], [0, 0, 1, 0], [], []>} : vector<64x32xf32>, vector<16x32xf32>, vector<64x16xf32> -> vector<64x16xf32>
    %27 = arith.addf %26, %12 : vector<64x16xf32>
    %28 = vector.shape_cast %27 : vector<64x16xf32> to vector<2x4x8x16xf32>
    %cst_14 = arith.constant dense<0xFF800000> : vector<2x8x16xf32>
    %29 = vector.multi_reduction <maximumf>, %28, %cst_14 [1] : vector<2x4x8x16xf32> to vector<2x8x16xf32>
    %30 = vector.shape_cast %29 : vector<2x8x16xf32> to vector<2x1x8x16xf32>
    %31 = vector.broadcast %30 : vector<2x1x8x16xf32> to vector<2x4x8x16xf32>
    %32 = arith.subf %28, %31 : vector<2x4x8x16xf32>
    %33 = math.exp %32 : vector<2x4x8x16xf32>
    %cst_15 = arith.constant dense<0.000000e+00> : vector<2x8x16xf32>
    %34 = vector.multi_reduction <add>, %33, %cst_15 [1] : vector<2x4x8x16xf32> to vector<2x8x16xf32>
    %35 = vector.shape_cast %34 : vector<2x8x16xf32> to vector<2x1x8x16xf32>
    %36 = vector.broadcast %35 : vector<2x1x8x16xf32> to vector<2x4x8x16xf32>
    %37 = arith.divf %33, %36 : vector<2x4x8x16xf32>
    %38 = vector.shape_cast %37 : vector<2x4x8x16xf32> to vector<64x16xf32>
    %39 = arith.mulf %38, %13 : vector<64x16xf32>
    %cst_16 = arith.constant dense<0.000000e+00> : vector<64xf32>
    %40 = vector.multi_reduction <add>, %39, %cst_16 [1] : vector<64x16xf32> to vector<64xf32>
    %41 = vector.shape_cast %40 : vector<64xf32> to vector<64x1xf32>
    %42 = vector.shape_cast %20 : vector<16x32xf32> to vector<2x8x32xf32>
    %cst_17 = arith.constant dense<0.000000e+00> : vector<2x32xf32>
    %43 = vector.multi_reduction <add>, %42, %cst_17 [1] : vector<2x8x32xf32> to vector<2x32xf32>
    %44 = vector.shape_cast %43 : vector<2x32xf32> to vector<2x1x32xf32>
    %45 = vector.broadcast %41 : vector<64x1xf32> to vector<64x32xf32>
    %46 = arith.mulf %45, %11 : vector<64x32xf32>
    %47 = vector.shape_cast %46 : vector<64x32xf32> to vector<2x4x8x32xf32>
    %cst_18 = arith.constant dense<0.000000e+00> : vector<2x8x32xf32>
    %48 = vector.multi_reduction <add>, %47, %cst_18 [1] : vector<2x4x8x32xf32> to vector<2x8x32xf32>
    %49 = vector.broadcast %44 : vector<2x1x32xf32> to vector<2x8x32xf32>
    %50 = arith.mulf %48, %49 : vector<2x8x32xf32>
    %51 = vector.shape_cast %50 : vector<2x8x32xf32> to vector<16x32xf32>
    %c160 = arith.constant 160 : index
    %c0_19 = arith.constant 0 : index
    %52 = vector.load %arg3[%c160, %c0_19] : memref<192x128xf32, #tpu.memory_space<vmem>>, vector<32x128xf32>
    %cst_20 = arith.constant dense<0.000000e+00> : vector<16x128xf32>
    %53 = tpu.matmul %51, %52, %cst_20 {dimension_numbers = #tpu.dot_dimension_numbers<[1], [0], [0], [1], [0, 0, 1, 1], [], []>} : vector<16x32xf32>, vector<32x128xf32>, vector<16x128xf32> -> vector<16x128xf32>
    %54 = vector.extract_strided_slice %53 {offsets = [0, 0], sizes = [16, 32], strides = [1, 1]} : vector<16x128xf32> to vector<16x32xf32>
    %55 = vector.broadcast %4 : vector<1x32xf32> to vector<16x32xf32>
    %56 = arith.addf %54, %55 : vector<16x32xf32>
    %57 = arith.addf %56, %1 : vector<16x32xf32>
    %cst_21 = arith.constant dense<0.000000e+00> : vector<16xf32>
    %58 = vector.multi_reduction <add>, %57, %cst_21 [1] : vector<16x32xf32> to vector<16xf32>
    %59 = vector.shape_cast %58 : vector<16xf32> to vector<16x1xf32>
    %cst_22 = arith.constant 3.200000e+01 : f32
    %60 = vector.broadcast %cst_22 : f32 to vector<16x1xf32>
    %61 = arith.divf %59, %60 : vector<16x1xf32>
    %62 = vector.broadcast %61 : vector<16x1xf32> to vector<16x32xf32>
    %63 = arith.subf %57, %62 : vector<16x32xf32>
    %64 = arith.mulf %63, %63 : vector<16x32xf32>
    %cst_23 = arith.constant dense<0.000000e+00> : vector<16xf32>
    %65 = vector.multi_reduction <add>, %64, %cst_23 [1] : vector<16x32xf32> to vector<16xf32>
    %66 = vector.shape_cast %65 : vector<16xf32> to vector<16x1xf32>
    %cst_24 = arith.constant 3.200000e+01 : f32
    %67 = vector.broadcast %cst_24 : f32 to vector<16x1xf32>
    %68 = arith.divf %66, %67 : vector<16x1xf32>
    %69 = vector.broadcast %61 : vector<16x1xf32> to vector<16x32xf32>
    %70 = arith.subf %57, %69 : vector<16x32xf32>
    %cst_25 = arith.constant 9.99999974E-6 : f32
    %71 = vector.broadcast %cst_25 : f32 to vector<16x1xf32>
    %72 = arith.addf %68, %71 : vector<16x1xf32>
    %73 = math.rsqrt %72 : vector<16x1xf32>
    %74 = vector.broadcast %73 : vector<16x1xf32> to vector<16x32xf32>
    %75 = arith.mulf %70, %74 : vector<16x32xf32>
    %76 = vector.broadcast %5 : vector<1x32xf32> to vector<16x32xf32>
    %77 = arith.mulf %75, %76 : vector<16x32xf32>
    %78 = vector.broadcast %6 : vector<1x32xf32> to vector<16x32xf32>
    %79 = arith.addf %77, %78 : vector<16x32xf32>
    %c0_26 = arith.constant 0 : index
    %c0_27 = arith.constant 0 : index
    %80 = vector.load %arg3[%c0_26, %c0_27] : memref<192x128xf32, #tpu.memory_space<vmem>>, vector<32x128xf32>
    %c32 = arith.constant 32 : index
    %c0_28 = arith.constant 0 : index
    %81 = vector.load %arg3[%c32, %c0_28] : memref<192x128xf32, #tpu.memory_space<vmem>>, vector<128x128xf32>
    %cst_29 = arith.constant dense<0.000000e+00> : vector<16x128xf32>
    %82 = tpu.matmul %79, %80, %cst_29 {dimension_numbers = #tpu.dot_dimension_numbers<[1], [0], [0], [1], [0, 0, 1, 1], [], []>} : vector<16x32xf32>, vector<32x128xf32>, vector<16x128xf32> -> vector<16x128xf32>
    %83 = vector.broadcast %2 : vector<1x128xf32> to vector<16x128xf32>
    %84 = arith.addf %82, %83 : vector<16x128xf32>
    %cst_30 = arith.constant 0.000000e+00 : f32
    %85 = vector.broadcast %cst_30 : f32 to vector<16x128xf32>
    %86 = arith.maximumf %84, %85 : vector<16x128xf32>
    %cst_31 = arith.constant dense<0.000000e+00> : vector<16x128xf32>
    %87 = tpu.matmul %86, %81, %cst_31 {dimension_numbers = #tpu.dot_dimension_numbers<[1], [0], [0], [1], [0, 0, 1, 1], [], []>} : vector<16x128xf32>, vector<128x128xf32>, vector<16x128xf32> -> vector<16x128xf32>
    %88 = vector.extract_strided_slice %87 {offsets = [0, 0], sizes = [16, 32], strides = [1, 1]} : vector<16x128xf32> to vector<16x32xf32>
    %89 = vector.broadcast %7 : vector<1x32xf32> to vector<16x32xf32>
    %90 = arith.addf %88, %89 : vector<16x32xf32>
    %91 = arith.addf %90, %79 : vector<16x32xf32>
    %cst_32 = arith.constant dense<0.000000e+00> : vector<16xf32>
    %92 = vector.multi_reduction <add>, %91, %cst_32 [1] : vector<16x32xf32> to vector<16xf32>
    %93 = vector.shape_cast %92 : vector<16xf32> to vector<16x1xf32>
    %cst_33 = arith.constant 3.200000e+01 : f32
    %94 = vector.broadcast %cst_33 : f32 to vector<16x1xf32>
    %95 = arith.divf %93, %94 : vector<16x1xf32>
    %96 = vector.broadcast %95 : vector<16x1xf32> to vector<16x32xf32>
    %97 = arith.subf %91, %96 : vector<16x32xf32>
    %98 = arith.mulf %97, %97 : vector<16x32xf32>
    %cst_34 = arith.constant dense<0.000000e+00> : vector<16xf32>
    %99 = vector.multi_reduction <add>, %98, %cst_34 [1] : vector<16x32xf32> to vector<16xf32>
    %100 = vector.shape_cast %99 : vector<16xf32> to vector<16x1xf32>
    %cst_35 = arith.constant 3.200000e+01 : f32
    %101 = vector.broadcast %cst_35 : f32 to vector<16x1xf32>
    %102 = arith.divf %100, %101 : vector<16x1xf32>
    %103 = vector.broadcast %95 : vector<16x1xf32> to vector<16x32xf32>
    %104 = arith.subf %91, %103 : vector<16x32xf32>
    %cst_36 = arith.constant 9.99999974E-6 : f32
    %105 = vector.broadcast %cst_36 : f32 to vector<16x1xf32>
    %106 = arith.addf %102, %105 : vector<16x1xf32>
    %107 = math.rsqrt %106 : vector<16x1xf32>
    %108 = vector.broadcast %107 : vector<16x1xf32> to vector<16x32xf32>
    %109 = arith.mulf %104, %108 : vector<16x32xf32>
    %110 = vector.broadcast %8 : vector<1x32xf32> to vector<16x32xf32>
    %111 = arith.mulf %109, %110 : vector<16x32xf32>
    %112 = vector.broadcast %9 : vector<1x32xf32> to vector<16x32xf32>
    %113 = arith.addf %111, %112 : vector<16x32xf32>
    %c0_37 = arith.constant 0 : index
    %c0_38 = arith.constant 0 : index
    %114 = vector.load %arg5[%c0_37, %c0_38] : memref<16x32xf32, #tpu.memory_space<vmem>>, vector<16x32xf32>
    tpu.vector_store %arg5[%c0_37, %c0_38], %113 {strides = array<i32>} : memref<16x32xf32, #tpu.memory_space<vmem>>, vector<16x32xf32>,
    return
  }
  func.func @transform_0(%arg0: i32) -> (i32, i32) {
    %c0_i32 = arith.constant 0 : i32
    %c0_i32_0 = arith.constant 0 : i32
    %c0_i32_1 = arith.constant 0 : i32
    return %c0_i32, %c0_i32_0 : i32, i32
  }
  func.func @transform_1(%arg0: i32) -> (i32, i32) {
    %c0_i32 = arith.constant 0 : i32
    %c0_i32_0 = arith.constant 0 : i32
    %c0_i32_1 = arith.constant 0 : i32
    return %c0_i32, %c0_i32_0 : i32, i32
  }
  func.func @transform_2(%arg0: i32) -> (i32, i32) {
    %c0_i32 = arith.constant 0 : i32
    %c0_i32_0 = arith.constant 0 : i32
    %c0_i32_1 = arith.constant 0 : i32
    return %c0_i32, %c0_i32_0 : i32, i32
  }
  func.func @transform_3(%arg0: i32) -> (i32, i32) {
    %c0_i32 = arith.constant 0 : i32
    %c0_i32_0 = arith.constant 0 : i32
    %c0_i32_1 = arith.constant 0 : i32
    return %c0_i32, %c0_i32_0 : i32, i32
  }
  func.func @transform_4(%arg0: i32) -> (i32, i32) {
    %c0_i32 = arith.constant 0 : i32
    %c0_i32_0 = arith.constant 0 : i32
    %c0_i32_1 = arith.constant 0 : i32
    return %c0_i32, %c0_i32_0 : i32, i32
  }
}

</mosaic_0001>

<bundles_post_ra>
// kernel: mul.58
= control target key start
LH: loop header
LB: loop body
LE: loop exit
PB: predicated region body
PF: predicated region fallthrough
CT: control target
= control target key end

     0   :  { %s56_s0 = inlined_call_operand.vmem [shape: f32[64,16], index: 0, kind: input, shape index: {}]   ;;  %s57_s1 = inlined_call_operand.vmem [shape: f32[64,16], index: 1, kind: input, shape index: {}]   ;;  %s58_s2 = inlined_call_operand.vmem [shape: f32[64,16], index: 2, kind: output, shape index: {}]  }
   0x1   :  { %v3_v0 = vld [vmem:[%s56_s0] sm:$0xff]  ;;  %v20_v2 = vld [vmem:[%s56_s0 + $0x8] sm:$0xff] }
   0x2   :  { %v4_v1 = vld [vmem:[%s57_s1] sm:$0xff]  ;;  %v21_v4 = vld [vmem:[%s57_s1 + $0x8] sm:$0xff] }
   0x3   :  { %v7_v3 = vmul.f32 %v4_v1, %v3_v0  ;;  %v16_v5 = vmul.f32 %v21_v4, %v20_v2 }
   0x5   :  { %9 = vst [vmem:[%s58_s2] sm:$0xff] %v7_v3  ;;  %22 = vst [vmem:[%s58_s2 + $0x8] sm:$0xff] %v16_v5 }

// kernel: transformer_block.1
= control target key start
LH: loop header
LB: loop body
LE: loop exit
PB: predicated region body
PF: predicated region fallthrough
CT: control target
= control target key end

     0   :  { %vm52_vm0 = vcmask 785408   ;;  %s1522_s0 = inlined_call_operand.vmem [shape: f32[16,96], index: 0, kind: input, shape index: {}]   ;;  %s1523_s1 = inlined_call_operand.vmem [shape: f32[96,96], index: 1, kind: input, shape index: {}]   ;;  %s1524_s2 = inlined_call_operand.vmem [shape: f32[192,128], index: 2, kind: input, shape index: {}]   ;;  %s1525_s3 = inlined_call_operand.vmem [shape: f32[72,128], index: 3, kind: input, shape index: {}]   ;;  %s1526_s4 = inlined_call_operand.hbm [shape: f32[16,32], index: 4, kind: output, shape index: {}]  }
   0x1   :  { %v36_v0 = vld [vmem:[%s1523_s1] sm:$0xff]  ;;  %v37_v1 = vld [vmem:[%s1523_s1 + $0x8] sm:$0xff]  ;;  %v38_v2 = vld [vmem:[%s1523_s1 + $0x10] sm:$0xff] }
   0x2   :  { %v1036_v3 = vpack.c.bf16 %v37_v1, %v36_v0  ;;  %v39_v4 = vld [vmem:[%s1523_s1 + $0x18] sm:$0xff]  ;;  %v40_v6 = vld [vmem:[%s1523_s1 + $0x20] sm:$0xff]  ;;  %v41_v7 = vld [vmem:[%s1523_s1 + $0x28] sm:$0xff] }
   0x3   :  { %v1040_v5 = vpack.c.bf16 %v39_v4, %v38_v2  ;;  %v1229_v8 = vld [vmem:[%s1522_s0] sm:$0xff] }
   0x4   :  { %1037 = vmatprep.subr.bf16.mxu0 %v1036_v3 }
   0x5   :  { %1039 = vmatpush3.bf16.msra.mxu0 %v1036_v3 }
   0x6   :  { %9 = vsyncpa [#allocation3], 0  ;;  %1041 = vmatprep.subr.bf16.mxu0 %v1040_v5  ;;  %v1044_v9 = vpack.c.bf16 %v41_v7, %v40_v6  ;;  %960 = vmatprep.mubr.msk.f32.mxu0 %vm52_vm0, %v1229_v8  ;;  %v42_v10 = vld [vmem:[%s1523_s1 + $0x30] sm:$0xff]  ;;  %v43_v11 = vld [vmem:[%s1523_s1 + $0x38] sm:$0xff]  ;;  %vm180_vm1 = vcmask 261120   ;;  %s1178_s6 = smov 80  }
   0x7   :  { %v1048_v12 = vpack.c.bf16 %v43_v11, %v42_v10  ;;  %v44_v13 = vld [vmem:[%s1523_s1 + $0x40] sm:$0xff]  ;;  %v45_v14 = vld [vmem:[%s1523_s1 + $0x48] sm:$0xff]  ;;  %v46_v16 = vld [vmem:[%s1523_s1 + $0x50] sm:$0xff]  ;;  %vm314_vm3 = vcmask 130048   ;;  %vm433_vm4 = vcmask 785920   ;;  %s1179_s17 = smov 64  }
   0x8   :  { %v1052_v15 = vpack.c.bf16 %v45_v14, %v44_v13  ;;  %v47_v17 = vld [vmem:[%s1523_s1 + $0x58] sm:$0xff]  ;;  %v1254_v19 = vld [vmem:[%s1522_s0 + $0x8] sm:$0xff]  ;;  %v1261_v20 = vld [vmem:[%s1525_s3 + $0x10] sm:$0xff]  ;;  %s1177_s1 = smov 96   ;;  %s1180_s15 = smov [#allocation2]  }
   0x9   :  { %1043 = vmatpush3.bf16.msra.mxu0 %v1040_v5  ;;  %v1056_v18 = vpack.c.bf16 %v47_v17, %v46_v16  ;;  %158 = vrot.lane.b32.xlu1 %v1261_v20, %s1177_s1  ;;  %v1267_v21 = vld [vmem:[%s1525_s3 + $0x18] sm:$0xff]  ;;  %v1273_v22 = vld [vmem:[%s1525_s3 + $0x28] sm:$0xff]  ;;  %v858_v24 = vld [vmem:[%s1525_s3 + $0x1] ss:$0 sm:$0xff]  ;;  %s847_s16 = sshll.u32 %s1180_s15, 4  ;;  %s848_s16 = int_to_ptr.vmem [resolvable:$true] %s847_s16 }
   0xa   :  { %1045 = vmatprep.subr.bf16.mxu0 %v1044_v9  ;;  %v1279_v23 = vld [vmem:[%s1525_s3 + $0x38] sm:$0xff]  ;;  %v1290_v28 = vld [vmem:[%s1525_s3 + $0x8] sm:$0xff]  ;;  %v1303_v32 = vld [vmem:[%s1525_s3 + $0x20] sm:$0xff]  ;;  %p1158_p1 = scmp.lt.s32.totalorder %s848_s16, %s848_s16 }
   0xb   :  { %v1309_v33 = vld [vmem:[%s1525_s3 + $0x30] sm:$0xff]  ;;  %v1316_v34 = vld [vmem:[%s1525_s3 + $0x40] sm:$0xff]  ;;  %vm1061_vm2 = vmpackc.low %vm180_vm1, %vm180_vm1 }
   0xd   :  { %1047 = vmatpush3.bf16.msra.mxu0 %v1044_v9  ;;  %160 = vrot.lane.b32.xlu1 %v1267_v21, %s1177_s1 }
   0xe   :  { %1049 = vmatprep.subr.bf16.mxu0 %v1048_v12 }
  0x11   :  { %1051 = vmatpush3.bf16.msra.mxu0 %v1048_v12  ;;  %164 = vrot.lane.b32.xlu1 %v1273_v22, %s1177_s1 }
  0x12   :  { %1053 = vmatprep.subr.bf16.mxu0 %v1052_v15 }
  0x15   :  { %1055 = vmatpush3.bf16.msra.mxu0 %v1052_v15  ;;  %168 = vrot.lane.b32.xlu1 %v1279_v23, %s1177_s1 }
  0x16   :  { %1057 = vmatprep.subr.bf16.mxu0 %v1056_v18 }
  0x19   :  { %1059 = vmatpush3.bf16.msra.mxu0 %v1056_v18  ;;  %377 = vrot.lane.b32.xlu1 %v1290_v28, %s1178_s6 }
  0x1c   :  { %961 = vmatmul.mubr.msk.f32.vlgmr.msra.gmra.mrb[0].mxu0 %vm52_vm0, %v1254_v19 }
  0x1d   :  { %385 = vrot.lane.b32.xlu1 %v1273_v22, %s1178_s6 }
  0x21   :  { %381 = vrot.lane.b32.xlu1 %v1267_v21, %s1178_s6 }
  0x25   :  { %383 = vrot.lane.b32.xlu1 %v1303_v32, %s1178_s6 }
  0x7b   :  { %v159_v47 = vpop.permute.xlu1 %158 }
  0x7f   :  { %v161_v49 = vpop.permute.xlu1 %160 }
  0x83   :  { %v165_v58 = vpop.permute.xlu1 %164 }
  0x87   :  { %v169_v7 = vpop.permute.xlu1 %168 }
  0xef   :  { %v962_v25 = vpop.f32.mrb[0].mxu0 }
  0xf0   :  { %v1285_v26 = vadd.f32 %v962_v25, %v858_v24  ;;  %v125_v27 = vpop.f32.mrb[1].mxu0 }
  0xf1   :  { %v1292_v29 = vadd.f32 %v858_v24, %v125_v27 }
  0xf2   :  { %v138_v42 = vmul.f32 %v1285_v26, %v1273_v22  ;;  %v139_v43 = vmul.f32 %v1285_v26, %v1309_v33  ;;  %v140_v44 = vmul.f32 %v1285_v26, %v1279_v23  ;;  %v141_v45 = vmul.f32 %v1285_v26, %v1316_v34 }
  0xf3   :  { %v1120_v30 = vpack.i.bf16 %v1285_v26, %v1292_v29  ;;  %v134_v31 = vmul.f32 %v1292_v29, %v1290_v28  ;;  %v135_v39 = vmul.f32 %v1292_v29, %v1261_v20  ;;  %v136_v40 = vmul.f32 %v1292_v29, %v1267_v21 }
  0xf4   :  { %v137_v41 = vmul.f32 %v1292_v29, %v1303_v32 }
  0xf5   :  { %1121 = vrot.lane.b32.xlu0 %v1120_v30, %s1177_s1  ;;  %967 = vmatprep.mubr.msk.f32.mxu1 %vm180_vm1, %v134_v31 }
  0xf9   :  { %156 = vrot.lane.b32.xlu0 %v1290_v28, %s1177_s1 }
  0xfd   :  { %162 = vrot.lane.b32.xlu0 %v1303_v32, %s1177_s1 }
 0x101   :  { %166 = vrot.lane.b32.xlu0 %v1309_v33, %s1177_s1 }
 0x105   :  { %170 = vrot.lane.b32.xlu0 %v1316_v34, %s1177_s1 }
 0x109   :  { %379 = vrot.lane.b32.xlu0 %v1261_v20, %s1178_s6 }
 0x10d   :  { %387 = vrot.lane.b32.xlu0 %v1309_v33, %s1178_s6 }
 0x111   :  { %389 = vrot.lane.b32.xlu0 %v1279_v23, %s1178_s6 }
 0x115   :  { %391 = vrot.lane.b32.xlu0 %v1316_v34, %s1178_s6 }
 0x167   :  { %v1122_v35 = vpop.permute.xlu0 %1121 }
 0x168   :  { %v1124_v36 = vunpack.i.h.bf16 %v1122_v35  ;;  %v1123_v37 = vunpack.i.l.bf16 %v1122_v35 }
 0x16a   :  { %v1060_v38 = vpack.c.bf16 %v1124_v36, %v1123_v37 }
 0x16b   :  { %v157_v46 = vpop.permute.xlu0 %156 }
 0x16c   :  { %1062 = vmatprep.subr.msk.bf16.mxu1 %vm1061_vm2, %v1060_v38 }
 0x16d   :  { %1065 = vmatpush3.bf16.xpose.msk.msra.mxu1 %vm1061_vm2, %v1060_v38 }
 0x16f   :  { %v163_v48 = vpop.permute.xlu0 %162 }
 0x173   :  { %v167_v55 = vpop.permute.xlu0 %166 }
 0x174   :  { %968 = vmatmul.mubr.msk.f32.vlgmr.msra.gmra.mrb[0].mxu1 %vm180_vm1, %v135_v39 }
 0x175   :  { %970 = vmatprep.mubr.msk.f32.mxu1 %vm180_vm1, %v136_v40 }
 0x177   :  { %v171_v6 = vpop.permute.xlu0 %170 }
 0x178   :  { %971 = vmatmul.mubr.msk.f32.gmra.mrb[2].mxu1 %vm180_vm1, %v137_v41 }
 0x179   :  { %973 = vmatprep.mubr.msk.f32.mxu1 %vm180_vm1, %v138_v42 }
 0x17c   :  { %974 = vmatmul.mubr.msk.f32.gmra.mrb[4].mxu1 %vm180_vm1, %v139_v43 }
 0x17d   :  { %976 = vmatprep.mubr.msk.f32.mxu1 %vm180_vm1, %v140_v44 }
 0x180   :  { %977 = vmatmul.mubr.msk.f32.gmra.mrb[6].mxu1 %vm180_vm1, %v141_v45 }
 0x247   :  { %v969_v50 = vpop.f32.mrb[0].mxu1 }
 0x248   :  { %v275_v51 = vpop.f32.mrb[1].mxu1  ;;  %v281_v52 = vadd.f32 %v969_v50, %v159_v47 }
 0x249   :  { %v276_v53 = vadd.f32 %v275_v51, %v157_v46 }
 0x24a   :  { %v316_v60 = vsel %vm314_vm3, %v281_v52, -inf }
 0x24b   :  { %v972_v54 = vpop.f32.mrb[2].mxu1  ;;  %v315_v62 = vsel %vm314_vm3, %v276_v53, -inf }
 0x24c   :  { %v291_v56 = vadd.f32 %v972_v54, %v163_v48  ;;  %v285_v57 = vpop.f32.mrb[3].mxu1 }
 0x24d   :  { %v286_v59 = vadd.f32 %v285_v57, %v161_v49 }
 0x24e   :  { %v319_v61 = vsel %vm314_vm3, %v291_v56, -inf }
 0x24f   :  { %v320_v63 = vmax.f32 %v316_v60, %v319_v61  ;;  %v317_v0 = vsel %vm314_vm3, %v286_v59, -inf  ;;  %v975_v1 = vpop.f32.mrb[4].mxu1 }
 0x250   :  { %v318_v2 = vmax.f32 %v315_v62, %v317_v0  ;;  %v295_v3 = vpop.f32.mrb[5].mxu1  ;;  %v301_v5 = vadd.f32 %v975_v1, %v167_v55 }
 0x251   :  { %v296_v9 = vadd.f32 %v295_v3, %v165_v58 }
 0x252   :  { %v321_v4 = vmax.f32 %v318_v2, %v320_v63  ;;  %v323_v25 = vsel %vm314_vm3, %v301_v5, -inf }
 0x253   :  { %v978_v10 = vpop.f32.mrb[6].mxu1  ;;  %v322_v27 = vsel %vm314_vm3, %v296_v9, -inf }
 0x254   :  { %v329_v11 = vsub.f32 %v276_v53, %v321_v4  ;;  %v330_v12 = vsub.f32 %v281_v52, %v321_v4  ;;  %v331_v13 = vsub.f32 %v286_v59, %v321_v4  ;;  %v332_v14 = vsub.f32 %v291_v56, %v321_v4  ;;  %v305_v15 = vpop.f32.mrb[7].mxu1  ;;  %v378_v59 = vpop.permute.xlu1 %377 }
 0x255   :  { %v311_v16 = vadd.f32 %v978_v10, %v171_v6  ;;  %v306_v17 = vadd.f32 %v305_v15, %v169_v7 }
 0x256   :  { %v339_v18 = vmul.f32 1.442695, %v330_v12  ;;  %v341_v24 = vmul.f32 1.442695, %v331_v13  ;;  %v337_v35 = vmul.f32 1.442695, %v329_v11 }
 0x257   :  { %v326_v30 = vsel %vm314_vm3, %v311_v16, -inf  ;;  %v324_v31 = vsel %vm314_vm3, %v306_v17, -inf  ;;  %v343_v38 = vmul.f32 1.442695, %v332_v14 }
 0x258   :  { %1125 = vpow2.f32 %v339_v18  ;;  %v327_v36 = vmax.f32 %v323_v25, %v326_v30  ;;  %v325_v37 = vmax.f32 %v322_v27, %v324_v31  ;;  %v386_v4 = vpop.permute.xlu1 %385 }
 0x259   :  { %1127 = vpow2.f32 %v341_v24 }
 0x25a   :  { %v328_v39 = vmax.f32 %v325_v37, %v327_v36  ;;  %1129 = vpow2.f32 %v337_v35 }
 0x25b   :  { %1131 = vpow2.f32 %v343_v38 }
 0x25c   :  { %v333_v40 = vsub.f32 %v296_v9, %v328_v39  ;;  %v334_v41 = vsub.f32 %v301_v5, %v328_v39  ;;  %v335_v42 = vsub.f32 %v306_v17, %v328_v39  ;;  %v336_v43 = vsub.f32 %v311_v16, %v328_v39  ;;  %v380_v9 = vpop.permute.xlu0 %379  ;;  %v382_v10 = vpop.permute.xlu1 %381 }
 0x25e   :  { %v347_v44 = vmul.f32 1.442695, %v334_v41  ;;  %v349_v45 = vmul.f32 1.442695, %v335_v42  ;;  %v345_v46 = vmul.f32 1.442695, %v333_v40 }
 0x25f   :  { %v351_v47 = vmul.f32 1.442695, %v336_v43 }
 0x260   :  { %1133 = vpow2.f32 %v347_v44  ;;  %v388_v16 = vpop.permute.xlu0 %387  ;;  %v384_v25 = vpop.permute.xlu1 %383 }
 0x261   :  { %1135 = vpow2.f32 %v349_v45 }
 0x262   :  { %v1126_v48 = vpop.eup %1125  ;;  %1137 = vpow2.f32 %v345_v46 }
 0x263   :  { %v1128_v49 = vpop.eup %1127  ;;  %v354_v50 = vsel %vm314_vm3, %v1126_v48, 0.0  ;;  %1139 = vpow2.f32 %v351_v47 }
 0x264   :  { %v1130_v51 = vpop.eup %1129  ;;  %v356_v55 = vsel %vm314_vm3, %v1128_v49, 0.0  ;;  %v390_v36 = vpop.permute.xlu0 %389 }
 0x265   :  { %v353_v52 = vsel %vm314_vm3, %v1130_v51, 0.0  ;;  %v1132_v53 = vpop.eup %1131 }
 0x266   :  { %v355_v54 = vadd.f32 %v354_v50, %v353_v52  ;;  %v358_v58 = vsel %vm314_vm3, %v1132_v53, 0.0 }
 0x268   :  { %v357_v56 = vadd.f32 %v356_v55, %v355_v54  ;;  %v392_v47 = vpop.permute.xlu0 %391 }
 0x26a   :  { %v1134_v57 = vpop.eup %1133  ;;  %v359_v60 = vadd.f32 %v358_v58, %v357_v56 }
 0x26b   :  { %v1136_v61 = vpop.eup %1135  ;;  %v361_v62 = vsel %vm314_vm3, %v1134_v57, 0.0 }
 0x26c   :  { %v1138_v63 = vpop.eup %1137  ;;  %1141 = vrcp.f32 %v359_v60  ;;  %v363_v3 = vsel %vm314_vm3, %v1136_v61, 0.0 }
 0x26d   :  { %v360_v0 = vsel %vm314_vm3, %v1138_v63, 0.0  ;;  %v1140_v1 = vpop.eup %1139 }
 0x26e   :  { %v362_v2 = vadd.f32 %v361_v62, %v360_v0  ;;  %v365_v6 = vsel %vm314_vm3, %v1140_v1, 0.0 }
 0x270   :  { %v364_v5 = vadd.f32 %v363_v3, %v362_v2  ;;  %v483_v2 = vld [vmem:[%s1524_s2 + $0xb8] sm:$0xff] }
 0x272   :  { %v366_v7 = vadd.f32 %v365_v6, %v364_v5 }
 0x274   :  { %1143 = vrcp.f32 %v366_v7 }
 0x276   :  { %v1142_v11 = vpop.eup %1141 }
 0x277   :  { %v368_v12 = vmul.f32 %v1142_v11, %v1130_v51  ;;  %v370_v13 = vmul.f32 %v1142_v11, %v1128_v49  ;;  %v369_v14 = vmul.f32 %v1142_v11, %v1126_v48  ;;  %v371_v15 = vmul.f32 %v1142_v11, %v1132_v53 }
 0x278   :  { %v441_v48 = vsel %vm433_vm4, %v1285_v26, 0.0  ;;  %v434_v49 = vsel %vm433_vm4, %v1292_v29, 0.0  ;;  %v480_v29 = vld [vmem:[%s1524_s2 + $0xa0] sm:$0xff] }
 0x279   :  { %v401_v17 = vmul.f32 %v378_v59, %v368_v12  ;;  %v402_v18 = vmul.f32 %v380_v9, %v369_v14  ;;  %v403_v24 = vmul.f32 %v382_v10, %v370_v13  ;;  %v404_v35 = vmul.f32 %v384_v25, %v371_v15 }
 0x27a   :  { %v442_v53 = vrot.slane %v441_v48, 4  ;;  %v435_v54 = vrot.slane %v434_v49, 4 }
 0x27b   :  { %v412_v27 = vsel %vm314_vm3, %v402_v18, 0.0  ;;  %v409_v30 = vsel %vm314_vm3, %v401_v17, 0.0  ;;  %v415_v37 = vsel %vm314_vm3, %v403_v24, 0.0  ;;  %v418_v45 = vsel %vm314_vm3, %v404_v35, 0.0 }
 0x27c   :  { %413 = vadd.xlane.f32.xlu0 %v412_v27  ;;  %410 = vadd.xlane.f32.xlu1 %v409_v30  ;;  %v443_v56 = vadd.f32 %v442_v53, %v441_v48 }
 0x27e   :  { %v1144_v31 = vpop.eup %1143  ;;  %v444_v58 = vrot.slane %v443_v56, 2 }
 0x27f   :  { %v373_v38 = vmul.f32 %v1144_v31, %v1138_v63  ;;  %v374_v39 = vmul.f32 %v1144_v31, %v1134_v57  ;;  %v375_v40 = vmul.f32 %v1144_v31, %v1136_v61  ;;  %v376_v41 = vmul.f32 %v1144_v31, %v1140_v1  ;;  %v481_v61 = vld [vmem:[%s1524_s2 + $0xa8] sm:$0xff]  ;;  %v482_v1 = vld [vmem:[%s1524_s2 + $0xb0] sm:$0xff] }
 0x280   :  { %416 = vadd.xlane.f32.xlu0 %v415_v37  ;;  %v436_v57 = vadd.f32 %v435_v54, %v434_v49  ;;  %v445_v60 = vadd.f32 %v444_v58, %v443_v56  ;;  %v1066_v63 = vpack.c.bf16 %v481_v61, %v480_v29  ;;  %v613_v29 = vld [vmem:[%s1524_s2 + $0x8] sm:$0xff] }
 0x281   :  { %v406_v42 = vmul.f32 %v388_v16, %v374_v39  ;;  %v405_v43 = vmul.f32 %v386_v4, %v373_v38  ;;  %v407_v44 = vmul.f32 %v390_v36, %v375_v40  ;;  %v408_v50 = vmul.f32 %v392_v47, %v376_v41 }
 0x282   :  { %v437_v59 = vrot.slane %v436_v57, 2  ;;  %v446_v62 = vrot.slane %v445_v60, 1  ;;  %1067 = vmatprep.subr.bf16.mxu0 %v1066_v63  ;;  %v1070_v4 = vpack.c.bf16 %v483_v2, %v482_v1  ;;  %v616_v1 = vld [vmem:[%s1524_s2 + $0x20] sm:$0xff]  ;;  %v617_v2 = vld [vmem:[%s1524_s2 + $0x28] sm:$0xff] }
 0x283   :  { %v424_v46 = vsel %vm314_vm3, %v406_v42, 0.0  ;;  %v421_v51 = vsel %vm314_vm3, %v405_v43, 0.0  ;;  %v427_v52 = vsel %vm314_vm3, %v407_v44, 0.0  ;;  %v430_v55 = vsel %vm314_vm3, %v408_v50, 0.0  ;;  %1069 = vmatpush3.bf16.msra.mxu0 %v1066_v63  ;;  %v615_v63 = vld [vmem:[%s1524_s2 + $0x18] sm:$0xff] }
 0x284   :  { %419 = vadd.xlane.f32.xlu0 %v418_v45  ;;  %425 = vadd.xlane.f32.xlu1 %v424_v46  ;;  %v438_v26 = vadd.f32 %v437_v59, %v436_v57  ;;  %v447_v3 = vadd.f32 %v446_v62, %v445_v60  ;;  %v873_v45 = vld [vmem:[%s1525_s3 + $0x2] ss:$0 sm:$0xff]  ;;  %v614_v62 = vld [vmem:[%s1524_s2 + $0x10] sm:$0xff] }
 0x285   :  { %1071 = vmatprep.subr.bf16.mxu0 %v1070_v4 }
 0x286   :  { %v439_v0 = vrot.slane %v438_v26, 1 }
 0x287   :  { %1073 = vmatpush3.bf16.msra.mxu0 %v1070_v4  ;;  %v1082_v4 = vpack.c.bf16 %v617_v2, %v616_v1 }
 0x288   :  { %422 = vadd.xlane.f32.xlu0 %v421_v51  ;;  %428 = vadd.xlane.f32.xlu1 %v427_v52  ;;  %v440_v5 = vadd.f32 %v439_v0, %v438_v26  ;;  %v612_v26 = vld [vmem:[%s1524_s2] sm:$0xff]  ;;  %v1078_v0 = vpack.c.bf16 %v615_v63, %v614_v62 }
 0x289   :  { %v1074_v61 = vpack.c.bf16 %v613_v29, %v612_v26  ;;  %1083 = vmatprep.subr.bf16.mxu1 %v1082_v4 }
 0x28a   :  { %1085 = vmatpush3.bf16.msra.mxu1 %v1082_v4 }
 0x28b   :  { %1075 = vmatprep.subr.bf16.mxu0 %v1074_v61 }
 0x28c   :  { %431 = vadd.xlane.f32.xlu1 %v430_v55 }
 0x29d   :  { %474 = vrot.lane.b32.xlu1 %v447_v3, %s1179_s17  ;;  %v618_v3 = vld [vmem:[%s1524_s2 + $0x30] sm:$0xff] }
 0x29e   :  { %472 = vrot.lane.b32.xlu0 %v440_v5, %s1179_s17  ;;  %v619_v5 = vld [vmem:[%s1524_s2 + $0x38] sm:$0xff]  ;;  %s1153_s17 = scalar_lea.vmem %s848_s16, 256 }
 0x29f   :  { %p1154_p0 = scmp.ne.s32.totalorder %s848_s16, %s1153_s17  ;;  %p1159_p2 = scmp.lt.s32.totalorder %s1153_s17, %s1153_s17 }
 0x2a1   :  { %p1160_p3 = por %p1159_p2, %p1158_p1 }
 0x2a3   :  { %p1161_p4 = pnand %p1160_p3, %p1154_p0 }
 0x309   :  { %v414_v6 = vpop.xlane.xlu0 %413  ;;  %v411_v7 = vpop.xlane.xlu1 %410 }
 0x30a   :  { %v449_v9 = vmul.f32 %v414_v6, %v1261_v20  ;;  %v448_v10 = vmul.f32 %v411_v7, %v1290_v28  ;;  %v1086_v6 = vpack.c.bf16 %v619_v5, %v618_v3  ;;  %v620_v7 = vld [vmem:[%s1524_s2 + $0x40] sm:$0xff] }
 0x30c   :  { %v457_v13 = vsel %vm180_vm1, %v449_v9, 0.0  ;;  %v456_v14 = vsel %vm180_vm1, %v448_v10, 0.0  ;;  %v621_v9 = vld [vmem:[%s1524_s2 + $0x48] sm:$0xff]  ;;  %1087 = vmatprep.subr.bf16.mxu1 %v1086_v6 }
 0x30d   :  { %v417_v11 = vpop.xlane.xlu0 %416  ;;  %v458_v24 = vadd.f32 %v457_v13, %v456_v14  ;;  %v1090_v10 = vpack.c.bf16 %v621_v9, %v620_v7  ;;  %1089 = vmatpush3.bf16.msra.mxu1 %v1086_v6  ;;  %v624_v14 = vld [vmem:[%s1524_s2 + $0x60] sm:$0xff] }
 0x30e   :  { %v450_v12 = vmul.f32 %v417_v11, %v1267_v21  ;;  %v622_v11 = vld [vmem:[%s1524_s2 + $0x50] sm:$0xff] }
 0x30f   :  { %1091 = vmatprep.subr.bf16.mxu1 %v1090_v10 }
 0x310   :  { %v459_v18 = vsel %vm180_vm1, %v450_v12, 0.0  ;;  %v623_v12 = vld [vmem:[%s1524_s2 + $0x58] sm:$0xff] }
 0x311   :  { %v420_v15 = vpop.xlane.xlu0 %419  ;;  %v426_v16 = vpop.xlane.xlu1 %425  ;;  %v460_v30 = vadd.f32 %v459_v18, %v458_v24  ;;  %v1094_v13 = vpack.c.bf16 %v623_v12, %v622_v11  ;;  %1093 = vmatpush3.bf16.msra.mxu1 %v1090_v10  ;;  %v627_v18 = vld [vmem:[%s1524_s2 + $0x78] sm:$0xff]  ;;  %v880_v11 = vld [vmem:[%s1525_s3 + $0x6] ss:$0 sm:$0xff] }
 0x312   :  { %v451_v17 = vmul.f32 %v420_v15, %v1303_v32  ;;  %v453_v25 = vmul.f32 %v426_v16, %v1309_v33  ;;  %v625_v15 = vld [vmem:[%s1524_s2 + $0x68] sm:$0xff] }
 0x313   :  { %1095 = vmatprep.subr.bf16.mxu1 %v1094_v13  ;;  %v1098_v16 = vpack.c.bf16 %v625_v15, %v624_v14  ;;  %v881_v15 = vld [vmem:[%s1525_s3 + $0x7] ss:$0 sm:$0xff] }
 0x314   :  { %v461_v20 = vsel %vm180_vm1, %v451_v17, 0.0  ;;  %v464_v35 = vsel %vm180_vm1, %v453_v25, 0.0  ;;  %v626_v17 = vld [vmem:[%s1524_s2 + $0x70] sm:$0xff]  ;;  %v628_v25 = vld [vmem:[%s1524_s2 + $0x80] sm:$0xff] }
 0x315   :  { %v423_v27 = vpop.xlane.xlu0 %422  ;;  %v429_v28 = vpop.xlane.xlu1 %428  ;;  %v462_v37 = vadd.f32 %v461_v20, %v460_v30  ;;  %1097 = vmatpush3.bf16.msra.mxu1 %v1094_v13  ;;  %v1102_v24 = vpack.c.bf16 %v627_v18, %v626_v17  ;;  %v629_v20 = vld [vmem:[%s1524_s2 + $0x88] sm:$0xff] }
 0x316   :  { %v452_v21 = vmul.f32 %v423_v27, %v1273_v22  ;;  %v454_v31 = vmul.f32 %v429_v28, %v1279_v23  ;;  %1099 = vmatprep.subr.bf16.mxu1 %v1098_v16  ;;  %v1106_v27 = vpack.c.bf16 %v629_v20, %v628_v25 }
 0x318   :  { %v463_v36 = vsel %vm180_vm1, %v452_v21, 0.0  ;;  %v466_v40 = vsel %vm180_vm1, %v454_v31, 0.0 }
 0x319   :  { %v465_v32 = vadd.f32 %v464_v35, %v463_v36  ;;  %v473_v38 = vpop.permute.xlu0 %472  ;;  %v432_v39 = vpop.xlane.xlu1 %431  ;;  %1101 = vmatpush3.bf16.msra.mxu1 %v1098_v16 }
 0x31a   :  { %v478_v33 = vmul.f32 %v473_v38, %v462_v37  ;;  %v455_v41 = vmul.f32 %v432_v39, %v1316_v34  ;;  %1103 = vmatprep.subr.bf16.mxu1 %v1102_v24 }
 0x31b   :  { %v467_v42 = vadd.f32 %v466_v40, %v465_v32  ;;  %v874_v32 = vld [vmem:[%s1525_s3 + $0x3] ss:$0 sm:$0xff] }
 0x31c   :  { %v468_v43 = vsel %vm180_vm1, %v455_v41, 0.0  ;;  %987 = vmatprep.mubr.msk.f32.mxu0 %vm180_vm1, %v478_v33  ;;  %v875_v33 = vld [vmem:[%s1525_s3 + $0x4] ss:$0 sm:$0xff] }
 0x31d   :  { %v469_v22 = vadd.f32 %v468_v43, %v467_v42  ;;  %v475_v23 = vpop.permute.xlu1 %474  ;;  %1105 = vmatpush3.bf16.msra.mxu1 %v1102_v24 }
 0x31e   :  { %1107 = vmatprep.subr.bf16.mxu1 %v1106_v27 }
 0x31f   :  { %v479_v44 = vmul.f32 %v475_v23, %v469_v22  ;;  %v630_v23 = vld [vmem:[%s1524_s2 + $0x90] sm:$0xff] }
 0x321   :  { %988 = vmatmul.mubr.msk.f32.vlgmr.msra.gmra.mrb[2].mxu0 %vm180_vm1, %v479_v44  ;;  %1109 = vmatpush3.bf16.msra.mxu1 %v1106_v27  ;;  %v631_v44 = vld [vmem:[%s1524_s2 + $0x98] sm:$0xff] }
 0x322   :  { %1077 = vmatpush3.bf16.msra.mxu0 %v1074_v61 }
 0x323   :  { %1079 = vmatprep.subr.bf16.mxu0 %v1078_v0 }
 0x326   :  { %1081 = vmatpush3.bf16.msra.mxu0 %v1078_v0 }
 0x3f4   :  { %v989_v46 = vpop.f32.mrb[2].mxu0 }
 0x3f5   :  { %v570_v47 = vadd.f32 %v989_v46, %v873_v45  ;;  %v556_v48 = vpop.f32.mrb[3].mxu0  ;;  %v876_v46 = vld [vmem:[%s1525_s3] ss:$0 sm:$0xff] }
 0x3f6   :  { %v569_v49 = vadd.f32 %v873_v45, %v556_v48  ;;  %v1110_v45 = vpack.c.bf16 %v631_v44, %v630_v23 }
 0x3f7   :  { %v572_v34 = vadd.f32 %v570_v47, %v1254_v19 }
 0x3f8   :  { %v571_v50 = vadd.f32 %v569_v49, %v1229_v8  ;;  %1111 = vmatprep.subr.bf16.mxu1 %v1110_v45 }
 0x3f9   :  { %v576_v51 = vsel %vm180_vm1, %v572_v34, 0.0  ;;  %1113 = vmatpush3.bf16.msra.mxu1 %v1110_v45 }
 0x3fa   :  { %577 = vadd.xlane.f32.xlu0 %v576_v51  ;;  %v573_v52 = vsel %vm180_vm1, %v571_v50, 0.0 }
 0x3fb   :  { %574 = vadd.xlane.f32.xlu1 %v573_v52  ;;  %v879_v52 = vld [vmem:[%s1525_s3 + $0x5] ss:$0 sm:$0xff] }
 0x487   :  { %v578_v53 = vpop.xlane.xlu0 %577 }
 0x488   :  { %v581_v54 = vmul.f32 0.03125, %v578_v53  ;;  %v575_v55 = vpop.xlane.xlu1 %574 }
 0x489   :  { %v580_v56 = vmul.f32 0.03125, %v575_v55 }
 0x48a   :  { %v1412_v57 = vsub.f32 %v572_v34, %v581_v54 }
 0x48b   :  { %v1414_v58 = vsub.f32 %v571_v50, %v580_v56 }
 0x48c   :  { %v585_v59 = vmul.f32 %v1412_v57, %v1412_v57 }
 0x48d   :  { %v584_v8 = vmul.f32 %v1414_v58, %v1414_v58 }
 0x48e   :  { %v589_v19 = vsel %vm180_vm1, %v585_v59, 0.0 }
 0x48f   :  { %590 = vadd.xlane.f32.xlu1 %v589_v19  ;;  %v586_v60 = vsel %vm180_vm1, %v584_v8, 0.0 }
 0x490   :  { %587 = vadd.xlane.f32.xlu0 %v586_v60 }
 0x51c   :  { %v591_v28 = vpop.xlane.xlu1 %590 }
 0x51d   :  { %v593_v30 = vmul.f32 0.03125, %v591_v28  ;;  %v588_v21 = vpop.xlane.xlu0 %587 }
 0x51e   :  { %v592_v31 = vmul.f32 0.03125, %v588_v21 }
 0x51f   :  { %v595_v35 = vadd.f32 1e-05, %v593_v30 }
 0x520   :  { %v594_v36 = vadd.f32 1e-05, %v592_v31 }
 0x521   :  { %1145 = vrsqrt.f32 %v595_v35 }
 0x522   :  { %1147 = vrsqrt.f32 %v594_v36 }
 0x52b   :  { %v1146_v37 = vpop.eup %1145 }
 0x52c   :  { %v1148_v38 = vpop.eup %1147  ;;  %v599_v39 = vmul.f32 %v1146_v37, %v1412_v57 }
 0x52d   :  { %v598_v40 = vmul.f32 %v1148_v38, %v1414_v58 }
 0x52e   :  { %v605_v41 = vmul.f32 %v874_v32, %v599_v39 }
 0x52f   :  { %v604_v42 = vmul.f32 %v874_v32, %v598_v40 }
 0x530   :  { %v611_v22 = vadd.f32 %v875_v33, %v605_v41 }
 0x531   :  { %v610_v43 = vadd.f32 %v875_v33, %v604_v42 }
 0x533   :  { %998 = vmatprep.mubr.msk.f32.mxu0 %vm180_vm1, %v610_v43 }
 0x534   :  { %999 = vmatmul.mubr.msk.f32.vlgmr.msra.gmra.mrb[4].mxu0 %vm180_vm1, %v611_v22 }
 0x607   :  { %v1000_v47 = vpop.f32.mrb[4].mxu0 }
 0x608   :  { %v714_v48 = vadd.f32 %v1000_v47, %v876_v46  ;;  %v708_v49 = vpop.f32.mrb[5].mxu0 }
 0x609   :  { %v709_v34 = vadd.f32 %v876_v46, %v708_v49 }
 0x60a   :  { %v718_v51 = vmax.f32 %v714_v48, 0.0 }
 0x60b   :  { %v717_v50 = vmax.f32 %v709_v34, 0.0 }
 0x60d   :  { %1033 = vmatprep.mubr.f32.mxu1 %v717_v50 }
 0x60e   :  { %1034 = vmatmul.mubr.f32.vlgmr.msra.gmra.mrb[8].mxu1 %v718_v51 }
 0x6e1   :  { %v1035_v53 = vpop.f32.mrb[8].mxu1 }
 0x6e2   :  { %v799_v54 = vadd.f32 %v1035_v53, %v879_v52  ;;  %v785_v55 = vpop.f32.mrb[9].mxu1 }
 0x6e3   :  { %v798_v56 = vadd.f32 %v879_v52, %v785_v55 }
 0x6e4   :  { %v801_v57 = vadd.f32 %v799_v54, %v611_v22 }
 0x6e5   :  { %v800_v58 = vadd.f32 %v798_v56, %v610_v43 }
 0x6e6   :  { %v805_v59 = vsel %vm180_vm1, %v801_v57, 0.0 }
 0x6e7   :  { %806 = vadd.xlane.f32.xlu1 %v805_v59  ;;  %v802_v8 = vsel %vm180_vm1, %v800_v58, 0.0 }
 0x6e8   :  { %803 = vadd.xlane.f32.xlu0 %v802_v8 }
 0x774   :  { %v807_v19 = vpop.xlane.xlu1 %806 }
 0x775   :  { %v809_v60 = vmul.f32 0.03125, %v807_v19  ;;  %v804_v26 = vpop.xlane.xlu0 %803 }
 0x776   :  { %v808_v29 = vmul.f32 0.03125, %v804_v26 }
 0x777   :  { %v811_v61 = vsub.f32 %v801_v57, %v809_v60 }
 0x778   :  { %v810_v62 = vsub.f32 %v800_v58, %v808_v29 }
 0x779   :  { %v813_v63 = vmul.f32 %v811_v61, %v811_v61 }
 0x77a   :  { %v812_v0 = vmul.f32 %v810_v62, %v810_v62 }
 0x77b   :  { %v817_v1 = vsel %vm180_vm1, %v813_v63, 0.0 }
 0x77c   :  { %818 = vadd.xlane.f32.xlu1 %v817_v1  ;;  %v814_v2 = vsel %vm180_vm1, %v812_v0, 0.0 }
 0x77d   :  { %815 = vadd.xlane.f32.xlu0 %v814_v2 }
 0x809   :  { %v819_v3 = vpop.xlane.xlu1 %818 }
 0x80a   :  { %v821_v4 = vmul.f32 0.03125, %v819_v3  ;;  %v816_v5 = vpop.xlane.xlu0 %815 }
 0x80b   :  { %v820_v6 = vmul.f32 0.03125, %v816_v5 }
 0x80c   :  { %v823_v7 = vadd.f32 1e-05, %v821_v4 }
 0x80d   :  { %v822_v9 = vadd.f32 1e-05, %v820_v6 }
 0x80e   :  { %1149 = vrsqrt.f32 %v823_v7 }
 0x80f   :  { %1151 = vrsqrt.f32 %v822_v9 }
 0x818   :  { %v1150_v10 = vpop.eup %1149 }
 0x819   :  { %v1152_v12 = vpop.eup %1151  ;;  %v827_v13 = vmul.f32 %v1150_v10, %v811_v61 }
 0x81a   :  { %v826_v14 = vmul.f32 %v1152_v12, %v810_v62 }
 0x81b   :  { %v833_v16 = vmul.f32 %v880_v11, %v827_v13 }
 0x81c   :  { %v832_v17 = vmul.f32 %v880_v11, %v826_v14 }
 0x81d   :  { %v839_v18 = vadd.f32 %v881_v15, %v833_v16 }
 0x81e   :  { %v838_v24 = vadd.f32 %v881_v15, %v832_v17 }
 0x81f   :  { %841 = vst.msk [vmem:[#allocation2 + $0x8] sm:$0xff] %vm180_vm1, %v839_v18 }
 0x820   :  { %840 = vst.msk [vmem:[#allocation2] sm:$0xff] %vm180_vm1, %v838_v24 }
 0x821   :  { %1164 = shalt.err (!%p1161_p4)
}
 0x822   :  { %s1165_s1 = scalar_lea.hbm %s1526_s4, 256 }
 0x823   :  { %p1166_p5 = scmp.ne.s32.totalorder %s1526_s4, %s1165_s1  ;;  %p1169_p6 = scmp.lt.u32.totalorder %s1165_s1, %s1526_s4 }
 0x825   :  { %p1171_p7 = pnand %p1169_p6, %p1166_p5 }
 0x827   :  { %1174 = shalt.err (!%p1171_p7)
}
 0x828   :  { %s1181_s22 = smov 128   ;;  %s1182_s23 = smov 8  }
 0x829   :  { %853 = dma.vmem_to_hbm [thread:$0]  %s848_s16, 256, %s1526_s4, [#allocation3], %s1181_s22, %s1181_s22, %s1182_s23  }
 0x82a   :  { %1175 = dma.done.wait [#allocation3], 256  }
 0x82b   :  { %1176 = vsyncadd [#allocation3], 4294967040 }
 0x82c   :  { %857 = vsyncpa [#allocation3], 1 }

</bundles_post_ra>
